<compile_context>
chip_gen: v7x
topology: tpu7x:2x2x1
jax: 0.10.0
libtpu: 0.0.40
codegen_flags: <defaults>
</compile_context>

<pallas_src>
import jax
import jax.numpy as jnp
from jax.experimental import pallas as pl
from jax.experimental.pallas import tpu as pltpu

LANE = 128
MAX_TILE_LANES = 16 * 1024  # per-step lane tile cap (sized against v7x 64 MiB VMEM)


def _vacc_backend_kernel(wb_ref, x_ref, o_ref):
    """Synthetic VACC backend on one lane tile: heatmap = relu(W @ x + b).

    wb_ref: (K, C+1)  channel-mixing weights with bias folded in as last column
                      (resident across grid steps)
    x_ref:  (C, tN)   channels x flattened (batch*spatial) lane tile
    o_ref:  (K, tN)   heatmap lane tile
    """
    x = x_ref[...]                       # (C, tN)
    wb = wb_ref[...]                     # (K, C+1)
    c_dim = x.shape[0]
    # Contraction depth C is tiny (3): do it as C broadcast FMAs on the VPU
    # instead of a <1%-utilized MXU matmul.
    acc = wb[:, c_dim:c_dim + 1] + wb[:, 0:1] * x[0:1, :]        # bias + first FMA
    for c in range(1, c_dim):
        acc = acc + wb[:, c:c + 1] * x[c:c + 1, :]
    o_ref[...] = jnp.maximum(acc, 0.0).astype(o_ref.dtype)


def vacc_backend_extract(x_flat, weight, bias):
    """Run the synthetic backend on a whole batch folded into the lane axis.

    x_flat: (C, N) float32 with N = B*H*W
    weight: (K, C) float32
    bias:   (K, 1) float32
    returns (K, N) float32 heatmaps
    """
    C, N = x_flat.shape
    K = weight.shape[0]
    wb = jnp.concatenate([weight, bias], axis=1)               # (K, C+1)

    # Lane-dense tiling: tile size is a multiple of 128, capped, and we keep at
    # least 2 grid steps (when possible) so v7x's two TensorCores are both used.
    n_pad = ((N + LANE - 1) // LANE) * LANE
    min_blocks = 2 if n_pad >= 2 * LANE else 1
    n_blocks = max(pl.cdiv(n_pad, MAX_TILE_LANES), min_blocks)
    tn = ((pl.cdiv(n_pad, n_blocks) + LANE - 1) // LANE) * LANE
    n_pad = n_blocks * tn
    if n_pad != N:
        x_flat = jnp.pad(x_flat, ((0, 0), (0, n_pad - N)))

    out = pl.pallas_call(
        _vacc_backend_kernel,
        out_shape=jax.ShapeDtypeStruct((K, n_pad), jnp.float32),
        grid_spec=pltpu.PrefetchScalarGridSpec(
            num_scalar_prefetch=0,
            grid=(n_blocks,),
            in_specs=[
                pl.BlockSpec((K, C + 1), lambda i: (0, 0)),    # weights+bias (resident)
                pl.BlockSpec((C, tn), lambda i: (0, i)),       # activation lane tile
            ],
            out_specs=pl.BlockSpec((K, tn), lambda i: (0, i)),
        ),
        compiler_params=pltpu.CompilerParams(
            dimension_semantics=("parallel",),
        ),
    )(wb, x_flat)
    return out[:, :N]


class VACCWrapperJAX:
    """JAX/Pallas re-implementation of VACCWrapper.forward semantics.

    forward(inputs: dict[str, (B, C, H, W) array]) -> dict[str, (B, K, H, W) array]
    """

    def __init__(self, output_names, weight, bias):
        self._output_names = list(output_names)
        self._weight = jnp.asarray(weight, jnp.float32)                  # (K, C)
        self._bias = jnp.asarray(bias, jnp.float32).reshape(-1, 1)       # (K, 1)

    @property
    def output_names(self):
        return self._output_names

    def forward(self, inputs):
        input_list = list(inputs.values())
        batch_size = input_list[0].shape[0]
        if batch_size > 1:
            # mirrors the torch wrapper's warning (vacc only supports batch 1);
            # compute is still performed for the whole batch in one kernel call.
            pass

        K = self._weight.shape[0]
        per_input_heatmaps = []
        for _name, input_tensor in inputs.items():
            B, C, H, W = input_tensor.shape
            assert C == 3, "VACC backend expects 3-channel images"
            # fold batch into the lane axis: (B, C, H, W) -> (C, B*H*W)
            x_flat = jnp.transpose(input_tensor, (1, 0, 2, 3)).reshape(C, B * H * W)
            x_flat = x_flat.astype(jnp.float32)
            hm = vacc_backend_extract(x_flat, self._weight, self._bias)   # (K, B*H*W)
            hm = jnp.transpose(hm.reshape(K, B, H, W), (1, 0, 2, 3))      # (B, K, H, W)
            per_input_heatmaps.append(hm)

        # The torch wrapper stacks output[0] (the first input's per-batch result)
        # for every output name; the stacked result is exactly that heatmap array,
        # so return it directly instead of slice-then-stack.
        heatmap = per_input_heatmaps[0]
        return {name: heatmap for name in self._output_names}


if __name__ == "__main__":
    key = jax.random.PRNGKey(0)
    k_x, k_w, k_b = jax.random.split(key, 3)

    B, C, H, W = 2, 3, 16, 16   # image batch, NCHW
    K = 8                       # synthetic backend heatmap channels

    x = jax.random.normal(k_x, (B, C, H, W), dtype=jnp.float32)
    weight = jax.random.normal(k_w, (K, C), dtype=jnp.float32) * 0.1
    bias = jax.random.normal(k_b, (K, 1), dtype=jnp.float32) * 0.01

    wrapper = VACCWrapperJAX(output_names=["output"], weight=weight, bias=bias)
    outputs = wrapper.forward({"input": x})

    out = jax.block_until_ready(outputs["output"])
    assert out.shape == (B, K, H, W), out.shape

    # quick correctness check against plain JAX reference
    ref = jnp.maximum(
        jnp.einsum("kc,bchw->bkhw", weight, x) + bias.reshape(1, K, 1, 1), 0.0
    )
    assert jnp.allclose(out, ref, atol=1e-5), float(jnp.max(jnp.abs(out - ref)))

    print("KERNEL_OK")
</pallas_src>

<mosaic_0001>
module attributes {stable_mosaic.version = 11 : i64} {
  func.func @_vacc_backend_kernel(%arg0: i32, %arg1: memref<8x4xf32, #tpu.memory_space<vmem>>, %arg2: memref<3x256xf32, #tpu.memory_space<vmem>>, %arg3: memref<8x256xf32, #tpu.memory_space<vmem>>) attributes {dimension_semantics = [#tpu.dimension_semantics<parallel>], iteration_bounds = array<i64: 2>, scalar_prefetch = 0 : i64, scratch_operands = 0 : i64, tpu.core_type = #tpu.core_type<tc>, window_params = [{pipeline_mode = #tpu.pipeline_mode<synchronous>, transform_indices = @transform_0, window_bounds = array<i64: 8, 4>}, {transform_indices = @transform_1, window_bounds = array<i64: 3, 256>}, {transform_indices = @transform_2, window_bounds = array<i64: 8, 256>}]} {
    %c0 = arith.constant 0 : index
    %c0_0 = arith.constant 0 : index
    %0 = vector.load %arg2[%c0, %c0_0] : memref<3x256xf32, #tpu.memory_space<vmem>>, vector<3x256xf32>
    %c0_1 = arith.constant 0 : index
    %c0_2 = arith.constant 0 : index
    %1 = vector.load %arg1[%c0_1, %c0_2] : memref<8x4xf32, #tpu.memory_space<vmem>>, vector<8x4xf32>
    %2 = vector.extract_strided_slice %1 {offsets = [0, 3], sizes = [8, 1], strides = [1, 1]} : vector<8x4xf32> to vector<8x1xf32>
    %3 = vector.extract_strided_slice %1 {offsets = [0, 0], sizes = [8, 1], strides = [1, 1]} : vector<8x4xf32> to vector<8x1xf32>
    %4 = vector.extract_strided_slice %0 {offsets = [0, 0], sizes = [1, 256], strides = [1, 1]} : vector<3x256xf32> to vector<1x256xf32>
    %5 = vector.broadcast %3 : vector<8x1xf32> to vector<8x256xf32>
    %6 = vector.broadcast %4 : vector<1x256xf32> to vector<8x256xf32>
    %7 = arith.mulf %5, %6 : vector<8x256xf32>
    %8 = vector.broadcast %2 : vector<8x1xf32> to vector<8x256xf32>
    %9 = arith.addf %8, %7 : vector<8x256xf32>
    %10 = vector.extract_strided_slice %1 {offsets = [0, 1], sizes = [8, 1], strides = [1, 1]} : vector<8x4xf32> to vector<8x1xf32>
    %11 = vector.extract_strided_slice %0 {offsets = [1, 0], sizes = [1, 256], strides = [1, 1]} : vector<3x256xf32> to vector<1x256xf32>
    %12 = vector.broadcast %10 : vector<8x1xf32> to vector<8x256xf32>
    %13 = vector.broadcast %11 : vector<1x256xf32> to vector<8x256xf32>
    %14 = arith.mulf %12, %13 : vector<8x256xf32>
    %15 = arith.addf %9, %14 : vector<8x256xf32>
    %16 = vector.extract_strided_slice %1 {offsets = [0, 2], sizes = [8, 1], strides = [1, 1]} : vector<8x4xf32> to vector<8x1xf32>
    %17 = vector.extract_strided_slice %0 {offsets = [2, 0], sizes = [1, 256], strides = [1, 1]} : vector<3x256xf32> to vector<1x256xf32>
    %18 = vector.broadcast %16 : vector<8x1xf32> to vector<8x256xf32>
    %19 = vector.broadcast %17 : vector<1x256xf32> to vector<8x256xf32>
    %20 = arith.mulf %18, %19 : vector<8x256xf32>
    %21 = arith.addf %15, %20 : vector<8x256xf32>
    %cst = arith.constant 0.000000e+00 : f32
    %22 = vector.broadcast %cst : f32 to vector<8x256xf32>
    %23 = arith.maximumf %21, %22 : vector<8x256xf32>
    %c0_3 = arith.constant 0 : index
    %c0_4 = arith.constant 0 : index
    %24 = vector.load %arg3[%c0_3, %c0_4] : memref<8x256xf32, #tpu.memory_space<vmem>>, vector<8x256xf32>
    tpu.vector_store %arg3[%c0_3, %c0_4], %23 {strides = array<i32>} : memref<8x256xf32, #tpu.memory_space<vmem>>, vector<8x256xf32>,
    return
  }
  func.func @transform_0(%arg0: i32) -> (i32, i32) {
    %c0_i32 = arith.constant 0 : i32
    %c0_i32_0 = arith.constant 0 : i32
    %c0_i32_1 = arith.constant 0 : i32
    return %c0_i32, %c0_i32_0 : i32, i32
  }
  func.func @transform_1(%arg0: i32) -> (i32, i32) {
    %c0_i32 = arith.constant 0 : i32
    %c0_i32_0 = arith.constant 0 : i32
    return %c0_i32, %arg0 : i32, i32
  }
  func.func @transform_2(%arg0: i32) -> (i32, i32) {
    %c0_i32 = arith.constant 0 : i32
    %c0_i32_0 = arith.constant 0 : i32
    return %c0_i32, %arg0 : i32, i32
  }
}

</mosaic_0001>

<bundles_post_ra>
// kernel: tpu_custom_call.1
= control target key start
LH: loop header
LB: loop body
LE: loop exit
PB: predicated region body
PF: predicated region fallthrough
CT: control target
= control target key end

     0   :  { %7 = vsyncpa [#allocation3], 0  ;;  %s692_s0 = inlined_call_operand.vmem [shape: f32[8,4], index: 0, kind: input, shape index: {}]   ;;  %s693_s1 = inlined_call_operand.hbm [shape: f32[3,512], index: 1, kind: input, shape index: {}]   ;;  %s694_s2 = inlined_call_operand.hbm [shape: f32[8,512], index: 2, kind: output, shape index: {}]  }
   0x1   :  { %9 = vsyncpa [#allocation3 + $0x1], 0 }
   0x2   :  { %10 = vsyncpa [#allocation4], 0 }
   0x3   :  { %12 = vsyncpa [#allocation4 + $0x1], 0  ;;  %s527_s9 = smov 0   ;;  %s529_s10 = smov 0  }
   0x4   :  { %s531_s11 = smov 0   ;;  %s533_s12 = smov 0  }
   0x5 LB: > { %s548_s13 = sadd.s32 4294967295, %s504_s12   ;;  %s337_s14 = sadd.s32 4294967294, %s504_s12   ;;  %s504_s12 = sphi %s533_s12, %s709_s12   ;;  %s500_s11 = sphi %s531_s11, %s708_s11   ;;  %s496_s10 = sphi %s529_s10, %s707_s10   ;;  %s492_s9 = sphi %s527_s9, %s706_s9  }
   0x6   : > { %s552_s15 = sadd.s32 1, %s504_s12   ;;  %s46_s16 = sadd.s32 1, %s500_s11 }
   0x7   : > { %s43_s17 = ssub.s32 %s504_s12, %s552_s15  ;;  %p53_p0 = scmp.ne.s32.totalorder %s500_s11, %s496_s10 }
   0x8   : > { %p44_p1 = scmp.eq.s32.totalorder %s43_s17, 0  ;;  %p54_p2 = scmp.eq.s32.totalorder %s504_s12, 0 }
   0x9   : > { %p59_p3 = scmp.ne.s32.totalorder %s496_s10, %s492_s9  ;;  %p60_p4 = scmp.eq.s32.totalorder %s548_s13, 0 }
   0xa   : > { %s564_s18 = scalar_select %p44_p1, %s500_s11, %s46_s16  }
   0xb   : > { %p566_p5 = por %p54_p2, %p53_p0  ;;  %p570_p6 = por %p60_p4, %p59_p3 }
   0xc   : > { %p83_p7 = scmp.eq.s32.totalorder %s548_s13, 1  ;;  %p89_p8 = scmp.eq.s32.totalorder %s337_s14, 1 }
   0xd   : > { %p365_p10 = scmp.lt.s32.totalorder %s504_s12, 2  ;;  %s112_s23 = sand.u32 1, %s500_s11  }
   0xe   : > { %p577_p11 = por %p83_p7, %p53_p0  ;;  %p581_p12 = por %p89_p8, %p59_p3 }
   0xf   : > { %s351_s24 = sshll.u32 %s504_s12, 7  ;;  %s340_s25 = sshll.u32 %s112_s23, 3 }
  0x10   : > { %s698_s21 = scalar_select %p577_p11, 1, 0 }
  0x11   : > { %s699_s22 = scalar_select %p581_p12, 1, 0 }
  0x12   : > { %s590_s28 = scalar_lea.hbm %s693_s1, %s351_s24  ;;  %s116_s29 = scalar_lea.vmem [#allocation2], %s340_s25 }
  0x13   : > { %s124_s30 = sshll.u32 %s116_s29, 4  ;;  %p594_p13 = pnand %p365_p10, %p566_p5  ;;  %s598_s30 = int_to_ptr.vmem [resolvable:$true] %s124_s30 }
  0x14   : > { %s113_s4 = scalar_lea.sflag [#allocation3], %s112_s23  ;;  %s408_s5 = scalar_lea.hbm %s590_s28, 128 }
  0x15   : > { %p409_p2 = scmp.ne.s32.totalorder %s590_s28, %s408_s5  ;;  %p410_p3 = pneg %p594_p13 }
  0x16   : > { %s413_s8 = scalar_lea.hbm %s693_s1, 256  ;;  %p414_p5 = scmp.lt.u32.totalorder %s590_s28, %s693_s1 }
  0x17   : > { %p411_p4 = pnand %p410_p3, %p409_p2  ;;  %p415_p8 = scmp.lt.u32.totalorder %s413_s8, %s408_s5 }
  0x18   : > { %p417_p9 = scmp.lt.u32.totalorder %s408_s5, %s590_s28 }
  0x19   : > { %p412_p7 = pneg %p411_p4  ;;  %p416_p10 = por %p415_p8, %p414_p5 }
  0x1b   : > { %p418_p0 = por %p417_p9, %p416_p10 }
  0x1d   : > { %p419_p1 = pnand %p418_p0, %p412_p7 }
  0x1f   : > { %422 = shalt.err (!%p419_p1)
}
  0x20   : > { %s423_s17 = scalar_lea.vmem %s598_s30, 128  ;;  %s506_s19 = smov [#allocation2]  }
  0x21   : > { %p424_p2 = scmp.ne.s32.totalorder %s598_s30, %s423_s17  ;;  %s428_s23 = sshll.u32 %s506_s19, 4  ;;  %s429_s23 = int_to_ptr.vmem [resolvable:$false] %s428_s23 }
  0x22   : > { %s430_s24 = scalar_lea.vmem %s429_s23, 256  ;;  %p431_p11 = scmp.lt.s32.totalorder %s598_s30, %s429_s23 }
  0x23   : > { %p426_p4 = pnand %p424_p2, %p410_p3  ;;  %p432_p5 = scmp.lt.s32.totalorder %s430_s24, %s423_s17 }
  0x25   : > { %p427_p12 = pneg %p426_p4  ;;  %p433_p8 = por %p432_p5, %p431_p11 }
  0x27   : > { %p434_p9 = pnand %p433_p8, %p427_p12 }
  0x29   : > { %437 = shalt.err (!%p434_p9)
}
  0x2a   : > { %360 = dma.hbm_to_vmem [thread:$0]  (!%p594_p13), %s590_s28, 128, %s598_s30, %s113_s4  }
  0x2b   : > { %p701_p0 = scmp.lt.s32.totalorder %s504_s12, 3  ;;  %p702_p1 = scmp.ge.s32.totalorder %s504_s12, 1 }
  0x2d   : > { %p130_p3 = pnand %p702_p1, %p701_p0 }
  0x2e   : > { %s632_s25 = sand.u32 (!%p130_p3), 1, %s496_s10  }
  0x2f   : > { %133 = sbr.rel (%p130_p3) target bundleno = 212 (0xd4), region = 28  ;;  %s344_s26 = sshll.u32 (!%p130_p3), %s632_s25, 3 }
  0x30   : > { %s136_s27 = scalar_lea.sflag (!%p130_p3), [#allocation3], %s632_s25  ;;  %s139_s29 = scalar_lea.vmem (!%p130_p3), [#allocation2], %s344_s26 }
  0x36   : > { %483 = dma.done.wait (%p570_p6), %s136_s27, 128  }
  0x37   : > { %485 = vsyncadd (%p570_p6), %s136_s27, 4294967168  ;;  %v507_v0 = vmov 0   ;;  %v508_v1 = vmov 1   ;;  %v163_v2 = vld [vmem:[%s692_s0] sm:$0xff]  ;;  %v509_v3 = vmov 3   ;;  %v510_v4 = vmov 2  }
  0x38   : > { %403 = vset.pattern.permute.xlu0 %v507_v0  ;;  %405 = vset.pattern.permute.xlu1 %v508_v1  ;;  %v170_v5 = vlaneseq  ;;  %v162_v9 = vld [vmem:[%s139_s29] sm:$0x77]  ;;  %s345_s20 = sshll.u32 %s632_s25, 4  ;;  %s352_s3 = sshll.u32 %s548_s13, 8 }
  0x39   : > { %166 = vperm.xlu0 %403, %v163_v2   ;;  %197 = vperm.xlu1 %405, %v163_v2   ;;  %s159_s4 = scalar_lea.vmem [#allocation5], %s345_s20  ;;  %s648_s8 = scalar_lea.hbm %s694_s2, %s352_s3 }
  0x3a   : > { %v171_v6 = vshrl.u32 %v170_v5, 7  ;;  %s267_s5 = sshll.u32 %s159_s4, 4  ;;  %s253_s14 = scalar_lea.sflag [#allocation4], %s632_s25  ;;  %s650_s5 = int_to_ptr.vmem [resolvable:$true] %s267_s5 }
  0x3b   : > { %s438_s13 = scalar_lea.vmem %s650_s5, 256  ;;  %p703_p11 = scmp.ne.s32.totalorder %s698_s21, 0 }
  0x3c   : > { %v172_v7 = vsub.s32 0, %v171_v6  ;;  %v176_v8 = vsub.s32 4, %v171_v6  ;;  %v202_v10 = vsub.s32 1, %v171_v6  ;;  %v206_v11 = vsub.s32 5, %v171_v6  ;;  %p439_p6 = scmp.ne.s32.totalorder %s650_s5, %s438_s13  ;;  %s511_s16 = smov [#allocation5]  }
  0x3d   : > { %404 = vset.pattern.permute.xlu0 %v509_v3  ;;  %406 = vset.pattern.permute.xlu1 %v510_v4  ;;  %v228_v12 = vsub.s32 2, %v171_v6  ;;  %v232_v13 = vsub.s32 6, %v171_v6  ;;  %s442_s17 = sshll.u32 %s511_s16, 4  ;;  %s443_s17 = int_to_ptr.vmem [resolvable:$false] %s442_s17 }
  0x3e   : > { %191 = vperm.xlu0 %404, %v163_v2   ;;  %223 = vperm.xlu1 %406, %v163_v2   ;;  %v173_v14 = vrot.slane %v162_v9, %v172_v7  ;;  %v177_v15 = vrot.slane %v162_v9, %v176_v8  ;;  %v203_v16 = vrot.slane %v162_v9, %v202_v10  ;;  %p440_p12 = pnand %p439_p6, %p703_p11  ;;  %s444_s19 = scalar_lea.vmem %s443_s17, 512 }
  0x3f   : > { %v207_v17 = vrot.slane %v162_v9, %v206_v11  ;;  %v229_v18 = vrot.slane %v162_v9, %v228_v12  ;;  %v233_v19 = vrot.slane %v162_v9, %v232_v13  ;;  %p445_p7 = scmp.lt.s32.totalorder %s650_s5, %s443_s17  ;;  %p446_p10 = scmp.lt.s32.totalorder %s444_s19, %s438_s13 }
  0x40   : > { %v183_v21 = vrot.slane %v173_v14, %v172_v7  ;;  %v187_v22 = vrot.slane %v177_v15, %v172_v7  ;;  %v213_v24 = vrot.slane %v203_v16, %v202_v10  ;;  %p441_p13 = pneg %p440_p12 }
  0x41   : > { %v217_v25 = vrot.slane %v207_v17, %v202_v10  ;;  %v239_v26 = vrot.slane %v229_v18, %v228_v12  ;;  %v243_v27 = vrot.slane %v233_v19, %v228_v12  ;;  %p447_p2 = por %p446_p10, %p445_p7 }
  0x42   : > { %407 = vset.pattern.permute.xlu0 %v510_v4 }
  0x43   : > { %p448_p4 = pnand %p447_p2, %p441_p13 }
  0xb8   : > { %v167_v20 = vpop.permute.xlu0 %166  ;;  %v198_v23 = vpop.permute.xlu1 %197 }
  0xb9   : > { %v188_v28 = vmul.f32 %v183_v21, %v167_v20  ;;  %v189_v29 = vmul.f32 %v187_v22, %v167_v20  ;;  %v218_v30 = vmul.f32 %v213_v24, %v198_v23  ;;  %v219_v31 = vmul.f32 %v217_v25, %v198_v23 }
  0xbd   : > { %v192_v32 = vpop.permute.xlu0 %191  ;;  %v224_v33 = vpop.permute.xlu1 %223 }
  0xbe   : > { %v194_v34 = vadd.f32 %v192_v32, %v188_v28  ;;  %v195_v35 = vadd.f32 %v192_v32, %v189_v29  ;;  %v244_v36 = vmul.f32 %v239_v26, %v224_v33  ;;  %v245_v37 = vmul.f32 %v243_v27, %v224_v33 }
  0xc0   : > { %v220_v38 = vadd.f32 %v218_v30, %v194_v34  ;;  %v221_v39 = vadd.f32 %v219_v31, %v195_v35 }
  0xc2   : > { %v246_v40 = vadd.f32 %v244_v36, %v220_v38  ;;  %v247_v41 = vadd.f32 %v245_v37, %v221_v39 }
  0xc4   : > { %v248_v42 = vmax.f32 %v246_v40, 0.0  ;;  %v249_v43 = vmax.f32 %v247_v41, 0.0 }
  0xc6   : > { %250 = vst [vmem:[%s159_s4] sm:$0xff] %v248_v42  ;;  %251 = vst [vmem:[%s159_s4 + $0x8] sm:$0xff] %v249_v43 }
  0xc7   : > { %451 = shalt.err (!%p448_p4)
}
  0xc8   : > { %s452_s23 = scalar_lea.hbm %s648_s8, 256  ;;  %s456_s26 = scalar_lea.hbm %s694_s2, 512 }
  0xc9   : > { %p453_p5 = scmp.ne.s32.totalorder %s648_s8, %s452_s23  ;;  %p457_p0 = scmp.lt.u32.totalorder %s648_s8, %s694_s2 }
  0xca   : > { %p458_p1 = scmp.lt.u32.totalorder %s456_s26, %s452_s23  ;;  %p460_p6 = scmp.lt.u32.totalorder %s452_s23, %s648_s8 }
  0xcb   : > { %p454_p8 = pnand %p453_p5, %p703_p11 }
  0xcc   : > { %p459_p3 = por %p458_p1, %p457_p0 }
  0xcd   : > { %p455_p9 = pneg %p454_p8 }
  0xce   : > { %p461_p12 = por %p460_p6, %p459_p3 }
  0xd0   : > { %p462_p13 = pnand %p461_p12, %p455_p9 }
  0xd2   : > { %465 = shalt.err (!%p462_p13)
}
  0xd3   : > { %355 = dma.vmem_to_hbm [thread:$0]  (%p703_p11), %s650_s5, 256, %s648_s8, %s253_s14  }
  0xd4 PF: > { %s279_s28 = sand.u32 1, %s492_s9   ;;  %p704_p7 = scmp.ne.s32.totalorder %s699_s22, 0 }
  0xd5   : > { %p705_p10 = scmp.ge.s32.totalorder %s504_s12, 2  ;;  %s280_s30 = scalar_lea.sflag [#allocation4], %s279_s28 }
  0xd7   : > { %p362_p2 = pnand %p705_p10, %p704_p7 }
  0xd9   : > { %487 = dma.done.wait (!%p362_p2), %s280_s30, 256  }
  0xda   : > { %489 = vsyncadd (!%p362_p2), %s280_s30, 4294967040  ;;  %p15_p4 = scmp.ge.s32.totalorder %s552_s15, 4   ;;  %s706_s9 = smov %s496_s10 }
  0xdb   : > { %s707_s10 = smov %s500_s11  ;;  %s708_s11 = smov %s564_s18 }
  0xdc   : > { %s709_s12 = smov %s552_s15  ;;  %17 = sbr.rel (!%p15_p4) target bundleno = 5 (0x5), region = 73 }
  0xe3   :  { %285 = vsyncpa [#allocation3], 1 }
  0xe4   :  { %287 = vsyncpa [#allocation3 + $0x1], 1 }
  0xe5   :  { %288 = vsyncpa [#allocation4], 1 }
  0xe6   :  { %290 = vsyncpa [#allocation4 + $0x1], 1 }

</bundles_post_ra>
